<compile_context>
chip_gen: v7x
topology: tpu7x:2x2x1
jax: 0.10.0
libtpu: 0.0.40
codegen_flags: <defaults>
</compile_context>

<pallas_src>
import math

import jax
import jax.numpy as jnp
from jax import lax
from jax.experimental import pallas as pl
from jax.experimental.pallas import tpu as pltpu


# ----------------------------------------------------------------------------
# Codebook (glue): LightRNN factorizes token id -> (row, col) of a 2-D table.
# ----------------------------------------------------------------------------
class Codebook:
    def __init__(self, table_size):
        self.table_size = table_size
        self.vocab_size = table_size * table_size

    def lookup(self, token_ids):
        return token_ids // self.table_size, token_ids % self.table_size


def _round_up(x, m):
    return (x + m - 1) // m * m


def _sublane_multiple(*dtypes):
    """Minimum row-tile multiple implied by the narrowest dtype involved."""
    m = 8
    for dt in dtypes:
        isz = jnp.dtype(dt).itemsize
        if isz == 2:
            m = max(m, 16)
        elif isz == 1:
            m = max(m, 32)
    return m


def _vmem_budget_bytes():
    """Generation-aware VMEM cap: leave headroom for compiler scratch."""
    cap = 128 << 20
    try:
        info = pltpu.get_tpu_info()
        cap = int(getattr(info, "vmem_capacity_bytes", cap))
    except Exception:
        pass
    if cap <= (64 << 20):       # v7x-class: 64 MiB per TensorCore
        return 48 << 20
    return 96 << 20             # v5e / v6e: 128 MiB physical


def _pick_e_block(n_embd, max_lanes=1024):
    """Tile n_embd in multiples of 128 only when it is large."""
    if n_embd <= max_lanes or n_embd % 128 != 0:
        return n_embd
    cand = (min(max_lanes, n_embd) // 128) * 128
    while cand >= 128:
        if n_embd % cand == 0:
            return cand
        cand -= 128
    return n_embd


def _pick_token_block(n_tokens, sl, max_tt, preferred):
    """Pick (tokens_per_block, padded_token_count).

    Prefer a block that divides n_tokens exactly (no padding => no post-kernel
    trim copy, which would double output HBM traffic)."""
    max_tt = max(sl, (max_tt // sl) * sl)
    preferred = max(sl, min((int(preferred) // sl) * sl, max_tt))
    if n_tokens % sl == 0:
        cand = min(preferred, n_tokens)
        while cand >= sl and n_tokens % cand != 0:
            cand -= sl
        if cand >= sl and cand >= min(256, n_tokens):
            return cand, n_tokens                      # exact tiling, no pad
    blk = min(preferred, max(sl, _round_up(n_tokens, sl)))
    return blk, _round_up(n_tokens, blk)


# ----------------------------------------------------------------------------
# Kernel: fused one-hot x concatenated-table MXU gather for one token block.
#   ids_ref : (TT, 1)  int32 token ids
#   tab_ref : (2*TS, EB) concatenated [row_table; col_table] tile
#   out_ref : (TT, EB)  output tile
# ----------------------------------------------------------------------------
def _make_lightrnn_kernel(table_size):
    pow2 = (table_size & (table_size - 1)) == 0
    shift = int(math.log2(table_size)) if pow2 else 0
    mask = table_size - 1

    def kernel(ids_ref, tab_ref, out_ref):
        ids = ids_ref[...]                                    # (TT, 1) int32
        if pow2:
            rids = jnp.right_shift(ids, shift)
            cids = jnp.bitwise_and(ids, mask)
        else:
            rids = ids // table_size
            cids = ids % table_size
        tt = ids.shape[0]
        two_ts = tab_ref.shape[0]
        ts = two_ts // 2
        lane = lax.broadcasted_iota(jnp.int32, (tt, two_ts), 1)
        # Row hits land in [0, TS), col hits in [TS, 2*TS) -> disjoint, so the
        # OR-ed one-hot x table is exactly row_gather + col_gather.
        onehot = ((lane == rids) | (lane == cids + ts)).astype(tab_ref.dtype)
        acc = jnp.dot(onehot, tab_ref[...], preferred_element_type=jnp.float32)
        out_ref[...] = acc.astype(out_ref.dtype)

    return kernel


def lightrnn_embedding(token_ids, row_embed_w, col_embed_w, table_size,
                       tokens_per_block=None, out_dtype=None):
    """token_ids: (B, T) int. Returns (B, T, n_embd) in `out_dtype` (default: table dtype)."""
    B, T = token_ids.shape
    tab_rows, n_embd = row_embed_w.shape
    assert col_embed_w.shape == (tab_rows, n_embd)
    N = B * T

    tab_dtype = row_embed_w.dtype
    out_dtype = jnp.dtype(tab_dtype if out_dtype is None else out_dtype)
    tab_isz = jnp.dtype(tab_dtype).itemsize
    out_isz = out_dtype.itemsize

    sl = _sublane_multiple(tab_dtype, out_dtype)
    e_block = _pick_e_block(n_embd)

    # --- VMEM budgeting (generation-aware) -----------------------------------
    budget = _vmem_budget_bytes()
    table_bytes_1buf = 2 * tab_rows * e_block * tab_isz
    # Constant table index along the inner (token) grid axis => double
    # buffering buys nothing.  Only request single buffering when the table is
    # big enough to matter (keeps the tiny-table path on the default pipeline).
    if table_bytes_1buf >= (2 << 20):
        tab_spec = pl.BlockSpec((2 * tab_rows, e_block), lambda e, t: (0, e),
                                pipeline_mode=pl.Buffered(1))
        table_resident = table_bytes_1buf
    else:
        tab_spec = pl.BlockSpec((2 * tab_rows, e_block), lambda e, t: (0, e))
        table_resident = 2 * table_bytes_1buf          # default double-buffered

    # Per-token resident bytes: double-buffered output tile + lane-padded
    # (TT, 1) -> (TT, 128) int32 id tile (also double-buffered).
    per_token = 2 * e_block * out_isz + 2 * 128 * 4
    margin = 4 << 20
    max_tt = max(sl, (int(budget * 3 // 4) - table_resident - margin) // per_token)

    preferred = 2048 if tokens_per_block is None else int(tokens_per_block)
    tt, n_pad = _pick_token_block(N, sl, max_tt, preferred)

    # --- Inputs ---------------------------------------------------------------
    flat = token_ids.reshape(N).astype(jnp.int32)
    if n_pad != N:
        flat = jnp.pad(flat, (0, n_pad - N))           # id 0 is valid; trimmed below
    ids = flat.reshape(n_pad, 1)

    tab = jnp.concatenate([row_embed_w, col_embed_w], axis=0)   # (2*TS, E)

    n_tok_blocks = n_pad // tt
    n_e_blocks = n_embd // e_block
    grid = (n_e_blocks, n_tok_blocks)   # token axis innermost -> table tile reused

    vmem_need = table_resident + tt * per_token
    vmem_limit = int(min(max(int(1.5 * vmem_need) + (2 << 20), 8 << 20), budget))

    cost = pl.CostEstimate(
        flops=2 * n_pad * (2 * tab_rows) * n_embd,
        transcendentals=0,
        bytes_accessed=(n_pad * n_embd * out_isz + n_pad * 4
                        + n_e_blocks * 2 * tab_rows * e_block * tab_isz),
    )

    out_flat = pl.pallas_call(
        _make_lightrnn_kernel(int(table_size)),
        out_shape=jax.ShapeDtypeStruct((n_pad, n_embd), out_dtype),
        grid_spec=pltpu.PrefetchScalarGridSpec(
            num_scalar_prefetch=0,
            grid=grid,
            in_specs=[
                pl.BlockSpec((tt, 1), lambda e, t: (t, 0)),    # raw token ids
                tab_spec,                                      # fused [row;col] table
            ],
            out_specs=pl.BlockSpec((tt, e_block), lambda e, t: (t, e)),
        ),
        compiler_params=pltpu.CompilerParams(
            dimension_semantics=("parallel", "parallel"),
            vmem_limit_bytes=vmem_limit,
        ),
        cost_estimate=cost,
    )(ids, tab)

    if n_pad != N:
        out_flat = out_flat[:N]
    return out_flat.reshape(B, T, n_embd)


# ----------------------------------------------------------------------------
# Pure-JAX reference for correctness check.
# ----------------------------------------------------------------------------
def lightrnn_embedding_ref(token_ids, row_embed_w, col_embed_w, table_size,
                           out_dtype=None):
    row_ids = token_ids // table_size
    col_ids = token_ids % table_size
    out = (row_embed_w.astype(jnp.float32)[row_ids]
           + col_embed_w.astype(jnp.float32)[col_ids])
    dt = row_embed_w.dtype if out_dtype is None else out_dtype
    return out.astype(dt)


if __name__ == "__main__":
    key = jax.random.PRNGKey(0)
    k_row, k_col, k_tok = jax.random.split(key, 3)

    table_size = 16              # vocab = 256 factorized into 16 x 16
    n_embd = 128
    codebook = Codebook(table_size)
    std = n_embd ** (-0.5)

    row_w = jax.random.normal(k_row, (table_size, n_embd), dtype=jnp.float32) * std
    col_w = jax.random.normal(k_col, (table_size, n_embd), dtype=jnp.float32) * std

    # Case 1: f32, token count divides the block -> no padding / no trim copy.
    B, T = 2, 8
    toks = jax.random.randint(k_tok, (B, T), 0, codebook.vocab_size, dtype=jnp.int32)
    out = jax.block_until_ready(lightrnn_embedding(toks, row_w, col_w, table_size))
    ref = lightrnn_embedding_ref(toks, row_w, col_w, table_size)
    assert out.shape == (B, T, n_embd)
    assert jnp.allclose(out, ref, atol=1e-6, rtol=1e-6)

    # Case 2: ragged token count -> exercises the padding + trim fallback path.
    B2, T2 = 3, 5
    toks2 = jax.random.randint(jax.random.PRNGKey(1), (B2, T2), 0,
                               codebook.vocab_size, dtype=jnp.int32)
    out2 = jax.block_until_ready(lightrnn_embedding(toks2, row_w, col_w, table_size))
    ref2 = lightrnn_embedding_ref(toks2, row_w, col_w, table_size)
    assert out2.shape == (B2, T2, n_embd)
    assert jnp.allclose(out2, ref2, atol=1e-6, rtol=1e-6)

    # Case 3: bf16 tables + bf16 output -> exercises 16-row tile rounding and
    # the reduced-writeback output dtype path.
    row_w_bf = row_w.astype(jnp.bfloat16)
    col_w_bf = col_w.astype(jnp.bfloat16)
    B3, T3 = 2, 16
    toks3 = jax.random.randint(jax.random.PRNGKey(2), (B3, T3), 0,
                               codebook.vocab_size, dtype=jnp.int32)
    out3 = jax.block_until_ready(
        lightrnn_embedding(toks3, row_w_bf, col_w_bf, table_size,
                           out_dtype=jnp.bfloat16))
    ref3 = lightrnn_embedding_ref(toks3, row_w_bf, col_w_bf, table_size,
                                  out_dtype=jnp.bfloat16)
    assert out3.shape == (B3, T3, n_embd)
    assert jnp.allclose(out3.astype(jnp.float32), ref3.astype(jnp.float32),
                        atol=1e-2, rtol=1e-2)

    print("KERNEL_OK")
</pallas_src>

<mosaic_0001>
module attributes {stable_mosaic.version = 11 : i64} {
  func.func @kernel(%arg0: i32, %arg1: i32, %arg2: memref<16x1xi32, #tpu.memory_space<vmem>>, %arg3: memref<32x128xf32, #tpu.memory_space<vmem>>, %arg4: memref<16x128xf32, #tpu.memory_space<vmem>>) attributes {dimension_semantics = [#tpu.dimension_semantics<parallel>, #tpu.dimension_semantics<parallel>], iteration_bounds = array<i64: 1, 1>, scalar_prefetch = 0 : i64, scratch_operands = 0 : i64, tpu.core_type = #tpu.core_type<tc>, window_params = [{transform_indices = @transform_0, window_bounds = array<i64: 16, 1>}, {transform_indices = @transform_1, window_bounds = array<i64: 32, 128>}, {transform_indices = @transform_2, window_bounds = array<i64: 16, 128>}]} {
    %c0 = arith.constant 0 : index
    %c0_0 = arith.constant 0 : index
    %0 = vector.load %arg2[%c0, %c0_0] : memref<16x1xi32, #tpu.memory_space<vmem>>, vector<16x1xi32>
    %c4_i32 = arith.constant 4 : i32
    %1 = vector.broadcast %c4_i32 : i32 to vector<16x1xi32>
    %2 = arith.shrsi %0, %1 : vector<16x1xi32>
    %c15_i32 = arith.constant 15 : i32
    %3 = vector.broadcast %c15_i32 : i32 to vector<16x1xi32>
    %4 = arith.andi %0, %3 : vector<16x1xi32>
    %5 = tpu.iota {dimensions = array<i32: 1>} : vector<16x32xi32>
    %6 = vector.broadcast %2 : vector<16x1xi32> to vector<16x32xi32>
    %7 = arith.cmpi eq, %5, %6 : vector<16x32xi32>
    %c16_i32 = arith.constant 16 : i32
    %8 = vector.broadcast %c16_i32 : i32 to vector<16x1xi32>
    %9 = arith.addi %4, %8 : vector<16x1xi32>
    %10 = vector.broadcast %9 : vector<16x1xi32> to vector<16x32xi32>
    %11 = arith.cmpi eq, %5, %10 : vector<16x32xi32>
    %12 = arith.ori %7, %11 : vector<16x32xi1>
    %13 = arith.extui %12 : vector<16x32xi1> to vector<16x32xi32>
    %14 = arith.sitofp %13 : vector<16x32xi32> to vector<16x32xf32>
    %c0_1 = arith.constant 0 : index
    %c0_2 = arith.constant 0 : index
    %15 = vector.load %arg3[%c0_1, %c0_2] : memref<32x128xf32, #tpu.memory_space<vmem>>, vector<32x128xf32>
    %cst = arith.constant dense<0.000000e+00> : vector<16x128xf32>
    %16 = tpu.matmul %14, %15, %cst {dimension_numbers = #tpu.dot_dimension_numbers<[1], [0], [0], [1], [0, 0, 1, 1], [], []>} : vector<16x32xf32>, vector<32x128xf32>, vector<16x128xf32> -> vector<16x128xf32>
    %c0_3 = arith.constant 0 : index
    %c0_4 = arith.constant 0 : index
    %17 = vector.load %arg4[%c0_3, %c0_4] : memref<16x128xf32, #tpu.memory_space<vmem>>, vector<16x128xf32>
    tpu.vector_store %arg4[%c0_3, %c0_4], %16 {strides = array<i32>} : memref<16x128xf32, #tpu.memory_space<vmem>>, vector<16x128xf32>,
    return
  }
  func.func @transform_0(%arg0: i32, %arg1: i32) -> (i32, i32) {
    %c0_i32 = arith.constant 0 : i32
    %c0_i32_0 = arith.constant 0 : i32
    return %arg1, %c0_i32 : i32, i32
  }
  func.func @transform_1(%arg0: i32, %arg1: i32) -> (i32, i32) {
    %c0_i32 = arith.constant 0 : i32
    %c0_i32_0 = arith.constant 0 : i32
    return %c0_i32, %arg0 : i32, i32
  }
  func.func @transform_2(%arg0: i32, %arg1: i32) -> (i32, i32) {
    %c0_i32 = arith.constant 0 : i32
    return %arg1, %arg0 : i32, i32
  }
}

</mosaic_0001>

<bundles_post_ra>
// kernel: tpu_custom_call.1
= control target key start
LH: loop header
LB: loop body
LE: loop exit
PB: predicated region body
PF: predicated region fallthrough
CT: control target
= control target key end

     0   :  { %7 = vsyncpa [#allocation3], 0  ;;  %s305_s0 = inlined_call_operand.vmem [shape: s32[16,1], index: 0, kind: input, shape index: {}]   ;;  %s306_s1 = inlined_call_operand.hbm [shape: f32[32,128], index: 1, kind: input, shape index: {}]   ;;  %s307_s2 = inlined_call_operand.hbm [shape: f32[16,128], index: 2, kind: output, shape index: {}]  }
   0x1   :  { %8 = vsyncpa [#allocation4], 0  ;;  %s248_s9 = smov [#allocation2]   ;;  %s200_s13 = scalar_lea.hbm %s306_s1, 512 }
   0x2   :  { %s16_s10 = sshll.u32 %s248_s9, 4  ;;  %p201_p0 = scmp.ne.s32.totalorder %s306_s1, %s200_s13  ;;  %s17_s10 = int_to_ptr.vmem [resolvable:$true] %s16_s10 }
   0x3   :  { %p204_p1 = scmp.lt.u32.totalorder %s200_s13, %s306_s1 }
   0x5   :  { %p206_p2 = pnand %p204_p1, %p201_p0 }
   0x7   :  { %209 = shalt.err (!%p206_p2)
}
   0x8   :  { %s210_s18 = scalar_lea.vmem %s17_s10, 512  ;;  %p215_p4 = scmp.lt.s32.totalorder %s17_s10, %s17_s10 }
   0x9   :  { %p211_p3 = scmp.ne.s32.totalorder %s17_s10, %s210_s18  ;;  %p216_p5 = scmp.lt.s32.totalorder %s210_s18, %s210_s18 }
   0xb   :  { %p217_p6 = por %p216_p5, %p215_p4 }
   0xd   :  { %p218_p7 = pnand %p217_p6, %p211_p3 }
   0xf   :  { %221 = shalt.err (!%p218_p7)
}
  0x10   :  { %s249_s19 = smov 128   ;;  %s250_s20 = smov 8  }
  0x11   :  { %22 = dma.hbm_to_vmem [thread:$0]  %s306_s1, 512, %s17_s10, [#allocation3], %s249_s19, %s249_s19, %s250_s20  }
  0x12   :  { %244 = dma.done.wait [#allocation3], 512  }
  0x13   :  { %245 = vsyncadd [#allocation3], 4294966784  ;;  %v251_v0 = vmov 0   ;;  %v27_v1 = vld [vmem:[%s305_s0 + $0x8] sm:$0xff]  ;;  %v26_v2 = vld [vmem:[%s305_s0] sm:$0xff]  ;;  %v32_v15 = vlaneseq  ;;  %vm62_vm5 = vcmask 261120  }
  0x14   :  { %199 = vset.pattern.permute.xlu1 %v251_v0  ;;  %198 = vset.pattern.permute.xlu0 %v251_v0  ;;  %v58_v3 = vld [vmem:[#allocation2] sm:$0xff]  ;;  %v29_v4 = vshra.s32 %v27_v1, 4  ;;  %v31_v5 = vand.u32 15, %v27_v1  ;;  %v28_v6 = vshra.s32 %v26_v2, 4  ;;  %v30_v7 = vand.u32 15, %v26_v2  ;;  %v59_v8 = vld [vmem:[#allocation2 + $0x8] sm:$0xff] }
  0x15   :  { %v184_v9 = vpack.c.bf16 %v59_v8, %v58_v3  ;;  %v60_v12 = vld [vmem:[#allocation2 + $0x10] sm:$0xff]  ;;  %v61_v13 = vld [vmem:[#allocation2 + $0x18] sm:$0xff]  ;;  %v33_v18 = vand.u32 127, %v32_v15  ;;  %v252_v21 = vmov 0.0   ;;  %s253_s0 = smov [#allocation5]  }
  0x16   :  { %38 = vperm.xlu1 %199, %v29_v4   ;;  %35 = vperm.xlu0 %198, %v28_v6   ;;  %v43_v10 = vadd.s32 16, %v31_v5  ;;  %v42_v11 = vadd.s32 16, %v30_v7  ;;  %v188_v14 = vpack.c.bf16 %v61_v13, %v60_v12  ;;  %s151_s1 = sshll.u32 %s253_s0, 4  ;;  %s152_s1 = int_to_ptr.vmem [resolvable:$true] %s151_s1 }
  0x17   :  { %185 = vmatprep.subr.bf16.mxu0 %v184_v9  ;;  %s222_s27 = scalar_lea.vmem %s152_s1, 256  ;;  %p227_p9 = scmp.lt.s32.totalorder %s152_s1, %s152_s1 }
  0x18   :  { %187 = vmatpush3.bf16.msra.mxu0 %v184_v9  ;;  %p223_p8 = scmp.ne.s32.totalorder %s152_s1, %s222_s27  ;;  %p228_p10 = scmp.lt.s32.totalorder %s222_s27, %s222_s27 }
  0x19   :  { %189 = vmatprep.subr.bf16.mxu0 %v188_v14 }
  0x1a   :  { %48 = vperm.xlu1 %199, %v43_v10   ;;  %45 = vperm.xlu0 %198, %v42_v11   ;;  %p229_p11 = por %p228_p10, %p227_p9 }
  0x1c   :  { %191 = vmatpush3.bf16.msra.mxu0 %v188_v14  ;;  %p230_p12 = pnand %p229_p11, %p223_p8 }
  0x95   :  { %v39_v16 = vpop.permute.xlu1 %38  ;;  %v36_v17 = vpop.permute.xlu0 %35 }
  0x96   :  { %vm41_vm0 = vcmp.eq.s32.totalorder %v33_v18, %v39_v16  ;;  %vm40_vm3 = vcmp.eq.s32.totalorder %v33_v18, %v36_v17 }
  0x99   :  { %v49_v19 = vpop.permute.xlu1 %48  ;;  %v46_v20 = vpop.permute.xlu0 %45 }
  0x9a   :  { %vm51_vm1 = vcmp.eq.s32.totalorder %v33_v18, %v49_v19  ;;  %vm50_vm2 = vcmp.eq.s32.totalorder %v33_v18, %v46_v20 }
  0x9b   :  { %vm53_vm4 = vmor %vm41_vm0, %vm51_vm1 }
  0x9c   :  { %vm52_vm6 = vmor %vm40_vm3, %vm50_vm2  ;;  %v164_v22 = vsel %vm53_vm4, 1.0, %v252_v21 }
  0x9d   :  { %v163_v23 = vsel %vm52_vm6, 1.0, %v252_v21 }
  0x9e   :  { %181 = vmatprep.mubr.msk.f32.mxu0 %vm62_vm5, %v163_v23 }
  0x9f   :  { %182 = vmatmul.mubr.msk.f32.vlgmr.msra.gmra.mrb[0].mxu0 %vm62_vm5, %v164_v22 }
 0x172   :  { %v183_v24 = vpop.f32.mrb[0].mxu0 }
 0x173   :  { %145 = vst [vmem:[#allocation5 + $0x8] sm:$0xff] %v183_v24  ;;  %v135_v25 = vpop.f32.mrb[1].mxu0 }
 0x174   :  { %144 = vst [vmem:[#allocation5] sm:$0xff] %v135_v25 }
 0x175   :  { %233 = shalt.err (!%p230_p12)
}
 0x176   :  { %s234_s30 = scalar_lea.hbm %s307_s2, 256 }
 0x177   :  { %p235_p13 = scmp.ne.s32.totalorder %s307_s2, %s234_s30  ;;  %p238_p0 = scmp.lt.u32.totalorder %s234_s30, %s307_s2 }
 0x179   :  { %p240_p1 = pnand %p238_p0, %p235_p13 }
 0x17b   :  { %243 = shalt.err (!%p240_p1)
}
 0x17c   :  { %157 = dma.vmem_to_hbm [thread:$0]  %s152_s1, 256, %s307_s2, [#allocation4], %s249_s19, %s249_s19, %s250_s20  }
 0x17d   :  { %246 = dma.done.wait [#allocation4], 256  }
 0x17e   :  { %247 = vsyncadd [#allocation4], 4294967040 }
 0x17f   :  { %161 = vsyncpa [#allocation3], 1 }
 0x180   :  { %162 = vsyncpa [#allocation4], 1 }

</bundles_post_ra>
